<compile_context>
chip_gen: v5e
topology: v5e:2x2
jax: 0.10.0
libtpu: 0.0.40
codegen_flags: <defaults>
</compile_context>

<pallas_src>
import functools

import jax
import jax.numpy as jnp
from jax import lax
from jax.experimental import pallas as pl
from jax.experimental.pallas import tpu as pltpu


def _basic_block_kernel(x_ref, w1_ref, b1_ref, w2_ref, b2_ref, out_ref, *,
                        H, W, cp, nb):
    # x_ref  : (nb, cp, H*W)   nb images of this grid step, channel-padded
    # w*_ref : (3, cp, 3*cp)   conv weights, BN scale folded; [dy][cout, kw*cp+cin]
    # b*_ref : (cp, 1)         folded BN bias
    # out_ref: (nb, cp, H*W)
    HW = H * W
    ntot = nb * HW

    # Fold this step's images into the lane dimension: (nb,cp,HW) -> (cp,nb*HW).
    # Single HBM read of x: it is both the conv1 input and the residual shortcut.
    if nb == 1:
        x_full = x_ref[0].astype(jnp.float32)
    else:
        x_full = jnp.concatenate(
            [x_ref[i].astype(jnp.float32) for i in range(nb)], axis=-1)

    # Per-lane pixel coordinates within each image -> zero-padding masks for the
    # 3x3 halo.  Computed once, reused by both convs (and both roll directions).
    lane = lax.broadcasted_iota(jnp.int32, (cp, ntot), 1)
    col = lane % W
    pix = lane % HW
    col_ok = {-1: col >= 1, 0: None, 1: col < (W - 1)}          # dx taps
    row_ok = {-1: pix >= W, 0: None, 1: pix < (HW - W)}         # dy taps

    def conv3x3_bn_relu(inp, w_ref, b_ref):
        # Taps are in-register lane rolls (XLU) of `inp`, masked to reproduce
        # zero padding; 3 accumulating MXU dots (one per dy row-group) so the
        # roll/mask work of group g+1 overlaps the matmul of group g.
        acc = None
        for g, dy in enumerate((-1, 0, 1)):
            base = inp if dy == 0 else pltpu.roll(
                inp, shift=(-dy * W) % ntot, axis=1)
            if row_ok[dy] is not None:
                base = jnp.where(row_ok[dy], base, 0.0)
            taps = []
            for dx in (-1, 0, 1):
                p = base if dx == 0 else pltpu.roll(
                    base, shift=(-dx) % ntot, axis=1)
                if col_ok[dx] is not None:
                    p = jnp.where(col_ok[dx], p, 0.0)
                taps.append(p)
            rhs = jnp.concatenate(taps, axis=0)                  # (3*cp, ntot)
            lhs = w_ref[g]                                       # (cp, 3*cp)
            part = jnp.dot(lhs, rhs, preferred_element_type=jnp.float32)
            acc = part if acc is None else acc + part
        return jnp.maximum(acc + b_ref[...], 0.0)   # folded-BN bias + ReLU

    # conv1 -> BN1 -> ReLU     (Dropout2d is identity in eval mode)
    out1 = conv3x3_bn_relu(x_full, w1_ref, b1_ref)
    # conv2 -> BN2 -> ReLU     (Dropout2d is identity in eval mode)
    out2 = conv3x3_bn_relu(out1, w2_ref, b2_ref)

    # Residual add + final ReLU; lane-dense (HW >= 128), lane-aligned stores.
    res = jnp.maximum(out2 + x_full, 0.0).astype(out_ref.dtype)
    if nb == 1:
        out_ref[0] = res
    else:
        for i in range(nb):
            out_ref[i] = res[:, i * HW:(i + 1) * HW]


def _prep_conv_weight(w_oihw, bn_scale, cp):
    """(Cout, Cin, 3, 3) OIHW -> (3, cp, 3*cp) with BN scale folded in.

    Output layout: [dy_group][cout, kw*cp + cin], channels zero-padded to cp.
    """
    co, ci, kh, kw = w_oihw.shape
    w = w_oihw * bn_scale[:, None, None, None]       # fold BN scale (per Cout)
    w = jnp.transpose(w, (2, 0, 3, 1))               # (kh, co, kw, ci)
    w = jnp.pad(w, ((0, 0), (0, cp - co), (0, 0), (0, cp - ci)))
    return w.reshape(kh, cp, kw * cp)                # (3, cp, 3*cp)


@functools.partial(jax.jit, static_argnames=("grid_steps",))
def _basic_block_2_impl(x_nchw, w1_oihw, s1, b1, w2_oihw, s2, b2, *, grid_steps):
    N, C, H, W = x_nchw.shape
    HW = H * W
    CP = ((C + 7) // 8) * 8                  # channels padded to a sublane tile
    NB = N // grid_steps                     # images folded per grid step

    # Channel-pad x to a full sublane tile (a few KiB at this block size);
    # padded rows stay zero through both convs and the residual.
    x_p = jnp.pad(x_nchw.reshape(N, C, HW), ((0, 0), (0, CP - C), (0, 0)))

    w1_3d = _prep_conv_weight(w1_oihw, s1, CP)
    w2_3d = _prep_conv_weight(w2_oihw, s2, CP)
    b1_p = jnp.pad(b1.reshape(C, 1), ((0, CP - C), (0, 0)))
    b2_p = jnp.pad(b2.reshape(C, 1), ((0, CP - C), (0, 0)))

    kernel = functools.partial(_basic_block_kernel, H=H, W=W, cp=CP, nb=NB)

    out_p = pl.pallas_call(
        kernel,
        out_shape=jax.ShapeDtypeStruct((N, CP, HW), x_nchw.dtype),
        grid_spec=pltpu.PrefetchScalarGridSpec(
            num_scalar_prefetch=0,
            grid=(grid_steps,),
            in_specs=[
                pl.BlockSpec((NB, CP, HW), lambda n: (n, 0, 0)),
                pl.BlockSpec((3, CP, 3 * CP), lambda n: (0, 0, 0)),
                pl.BlockSpec((CP, 1), lambda n: (0, 0)),
                pl.BlockSpec((3, CP, 3 * CP), lambda n: (0, 0, 0)),
                pl.BlockSpec((CP, 1), lambda n: (0, 0)),
            ],
            out_specs=pl.BlockSpec((NB, CP, HW), lambda n: (n, 0, 0)),
        ),
        compiler_params=pltpu.CompilerParams(
            dimension_semantics=("parallel",)),
    )(x_p, w1_3d, b1_p, w2_3d, b2_p)

    return out_p[:, :C, :].reshape(N, C, H, W)


def basic_block_2(x_nchw, w1_oihw, s1, b1, w2_oihw, s2, b2, grid_steps=None):
    """Inference forward of BasicBlock_2.  x_nchw: (N, C, H, W) float32."""
    N, C, H, W = x_nchw.shape
    assert w1_oihw.shape[:2] == (C, C) and w2_oihw.shape[:2] == (C, C), \
        "identity shortcut requires in_planes == planes (stride=1)"
    if grid_steps is None:
        kind = jax.devices()[0].device_kind.lower()
        # v7x has 2 TensorCores per chip: keep >= 2 'parallel' grid steps there.
        # v5e/v6e are single-TC: fold the whole batch into one step.
        tcs = 2 if ("v7" in kind or "7x" in kind) else 1
        grid_steps = tcs if (N >= tcs and N % tcs == 0) else 1
    if (H * W) % 128 != 0:
        grid_steps = N          # keep per-image lane slabs 128-aligned
    return _basic_block_2_impl(x_nchw, w1_oihw, s1, b1, w2_oihw, s2, b2,
                               grid_steps=grid_steps)


def _reference(x_nchw, w1_oihw, s1, b1, w2_oihw, s2, b2):
    dn = ("NCHW", "OIHW", "NCHW")
    c1 = lax.conv_general_dilated(x_nchw, w1_oihw, (1, 1), ((1, 1), (1, 1)),
                                  dimension_numbers=dn)
    o1 = jnp.maximum(c1 * s1[None, :, None, None]
                     + b1[None, :, None, None], 0.0)
    c2 = lax.conv_general_dilated(o1, w2_oihw, (1, 1), ((1, 1), (1, 1)),
                                  dimension_numbers=dn)
    o2 = jnp.maximum(c2 * s2[None, :, None, None]
                     + b2[None, :, None, None], 0.0)
    return jnp.maximum(o2 + x_nchw, 0.0)


def _fold_bn(gamma, beta, mean, var, eps=1e-5):
    scale = gamma / jnp.sqrt(var + eps)
    return scale, beta - mean * scale


if __name__ == "__main__":
    key = jax.random.PRNGKey(0)
    N, C, H, W = 2, 4, 16, 16            # in_planes = planes = 4, stride = 1
    ks = jax.random.split(key, 12)

    x = jax.random.normal(ks[0], (N, C, H, W), jnp.float32)

    w1_oihw = jax.random.normal(ks[1], (C, C, 3, 3), jnp.float32) * 0.1
    w2_oihw = jax.random.normal(ks[2], (C, C, 3, 3), jnp.float32) * 0.1

    # BatchNorm parameters (inference: folded into per-channel scale/bias)
    g1 = 1.0 + 0.1 * jax.random.normal(ks[3], (C,), jnp.float32)
    be1 = 0.1 * jax.random.normal(ks[4], (C,), jnp.float32)
    m1 = 0.1 * jax.random.normal(ks[5], (C,), jnp.float32)
    v1 = jnp.abs(jax.random.normal(ks[6], (C,), jnp.float32)) + 0.5
    g2 = 1.0 + 0.1 * jax.random.normal(ks[7], (C,), jnp.float32)
    be2 = 0.1 * jax.random.normal(ks[8], (C,), jnp.float32)
    m2 = 0.1 * jax.random.normal(ks[9], (C,), jnp.float32)
    v2 = jnp.abs(jax.random.normal(ks[10], (C,), jnp.float32)) + 0.5

    s1, b1 = _fold_bn(g1, be1, m1, v1)
    s2, b2 = _fold_bn(g2, be2, m2, v2)

    out = basic_block_2(x, w1_oihw, s1, b1, w2_oihw, s2, b2)
    out = jax.block_until_ready(out)

    ref = _reference(x, w1_oihw, s1, b1, w2_oihw, s2, b2)
    assert out.shape == (N, C, H, W)
    assert jnp.allclose(out, ref, atol=2e-4, rtol=2e-4), "mismatch vs reference"

    print("KERNEL_OK")
</pallas_src>

<mosaic_0001>
module attributes {stable_mosaic.version = 11 : i64} {
  func.func @_basic_block_kernel(%arg0: i32, %arg1: memref<2x8x256xf32, #tpu.memory_space<vmem>>, %arg2: memref<3x8x24xf32, #tpu.memory_space<vmem>>, %arg3: memref<8x1xf32, #tpu.memory_space<vmem>>, %arg4: memref<3x8x24xf32, #tpu.memory_space<vmem>>, %arg5: memref<8x1xf32, #tpu.memory_space<vmem>>, %arg6: memref<2x8x256xf32, #tpu.memory_space<vmem>>) attributes {dimension_semantics = [#tpu.dimension_semantics<parallel>], iteration_bounds = array<i64: 1>, scalar_prefetch = 0 : i64, scratch_operands = 0 : i64, tpu.core_type = #tpu.core_type<tc>, window_params = [{transform_indices = @transform_0, window_bounds = array<i64: 2, 8, 256>}, {pipeline_mode = #tpu.pipeline_mode<synchronous>, transform_indices = @transform_1, window_bounds = array<i64: 3, 8, 24>}, {pipeline_mode = #tpu.pipeline_mode<synchronous>, transform_indices = @transform_2, window_bounds = array<i64: 8, 1>}, {pipeline_mode = #tpu.pipeline_mode<synchronous>, transform_indices = @transform_3, window_bounds = array<i64: 3, 8, 24>}, {pipeline_mode = #tpu.pipeline_mode<synchronous>, transform_indices = @transform_4, window_bounds = array<i64: 8, 1>}, {transform_indices = @transform_5, window_bounds = array<i64: 2, 8, 256>}]} {
    %c0 = arith.constant 0 : index
    %c0_0 = arith.constant 0 : index
    %c0_1 = arith.constant 0 : index
    %0 = vector.load %arg1[%c0, %c0_0, %c0_1] : memref<2x8x256xf32, #tpu.memory_space<vmem>>, vector<1x8x256xf32>
    %1 = vector.shape_cast %0 : vector<1x8x256xf32> to vector<8x256xf32>
    %c1 = arith.constant 1 : index
    %c0_2 = arith.constant 0 : index
    %c0_3 = arith.constant 0 : index
    %2 = vector.load %arg1[%c1, %c0_2, %c0_3] : memref<2x8x256xf32, #tpu.memory_space<vmem>>, vector<1x8x256xf32>
    %3 = vector.shape_cast %2 : vector<1x8x256xf32> to vector<8x256xf32>
    %4 = tpu.concatenate %1, %3 in 1 : vector<8x256xf32>, vector<8x256xf32> -> vector<8x512xf32>
    %5 = tpu.iota {dimensions = array<i32: 1>} : vector<8x512xi32>
    %c16_i32 = arith.constant 16 : i32
    %c0_i32 = arith.constant 0 : i32
    %6 = arith.cmpi eq, %c16_i32, %c0_i32 : i32
    %c1_i32 = arith.constant 1 : i32
    %7 = arith.select %6, %c1_i32, %c16_i32 : i32
    %8 = vector.broadcast %7 : i32 to vector<8x512xi32>
    %9 = arith.remsi %5, %8 : vector<8x512xi32>
    %c0_i32_4 = arith.constant 0 : i32
    %10 = vector.broadcast %c0_i32_4 : i32 to vector<8x512xi32>
    %11 = arith.cmpi ne, %9, %10 : vector<8x512xi32>
    %c0_i32_5 = arith.constant 0 : i32
    %12 = vector.broadcast %c0_i32_5 : i32 to vector<8x512xi32>
    %13 = arith.cmpi slt, %9, %12 : vector<8x512xi32>
    %c0_i32_6 = arith.constant 0 : i32
    %14 = arith.cmpi slt, %7, %c0_i32_6 : i32
    %15 = vector.broadcast %14 : i1 to vector<8x512xi1>
    %16 = vector.broadcast %15 : vector<8x512xi1> to vector<8x512xi1>
    %17 = arith.xori %13, %16 : vector<8x512xi1>
    %18 = arith.andi %17, %11 : vector<8x512xi1>
    %19 = vector.broadcast %7 : i32 to vector<8x512xi32>
    %20 = arith.addi %9, %19 : vector<8x512xi32>
    %21 = arith.select %18, %20, %9 : vector<8x512xi1>, vector<8x512xi32>
    %c256_i32 = arith.constant 256 : i32
    %c0_i32_7 = arith.constant 0 : i32
    %22 = arith.cmpi eq, %c256_i32, %c0_i32_7 : i32
    %c1_i32_8 = arith.constant 1 : i32
    %23 = arith.select %22, %c1_i32_8, %c256_i32 : i32
    %24 = vector.broadcast %23 : i32 to vector<8x512xi32>
    %25 = arith.remsi %5, %24 : vector<8x512xi32>
    %c0_i32_9 = arith.constant 0 : i32
    %26 = vector.broadcast %c0_i32_9 : i32 to vector<8x512xi32>
    %27 = arith.cmpi ne, %25, %26 : vector<8x512xi32>
    %c0_i32_10 = arith.constant 0 : i32
    %28 = vector.broadcast %c0_i32_10 : i32 to vector<8x512xi32>
    %29 = arith.cmpi slt, %25, %28 : vector<8x512xi32>
    %c0_i32_11 = arith.constant 0 : i32
    %30 = arith.cmpi slt, %23, %c0_i32_11 : i32
    %31 = vector.broadcast %30 : i1 to vector<8x512xi1>
    %32 = vector.broadcast %31 : vector<8x512xi1> to vector<8x512xi1>
    %33 = arith.xori %29, %32 : vector<8x512xi1>
    %34 = arith.andi %33, %27 : vector<8x512xi1>
    %35 = vector.broadcast %23 : i32 to vector<8x512xi32>
    %36 = arith.addi %25, %35 : vector<8x512xi32>
    %37 = arith.select %34, %36, %25 : vector<8x512xi1>, vector<8x512xi32>
    %c1_i32_12 = arith.constant 1 : i32
    %38 = vector.broadcast %c1_i32_12 : i32 to vector<8x512xi32>
    %39 = arith.cmpi sge, %21, %38 : vector<8x512xi32>
    %c15_i32 = arith.constant 15 : i32
    %40 = vector.broadcast %c15_i32 : i32 to vector<8x512xi32>
    %41 = arith.cmpi slt, %21, %40 : vector<8x512xi32>
    %c16_i32_13 = arith.constant 16 : i32
    %42 = vector.broadcast %c16_i32_13 : i32 to vector<8x512xi32>
    %43 = arith.cmpi sge, %37, %42 : vector<8x512xi32>
    %c240_i32 = arith.constant 240 : i32
    %44 = vector.broadcast %c240_i32 : i32 to vector<8x512xi32>
    %45 = arith.cmpi slt, %37, %44 : vector<8x512xi32>
    %c16_i32_14 = arith.constant 16 : i32
    %46 = tpu.dynamic_rotate %4 by %c16_i32_14 dim 1 : vector<8x512xf32>, i32 -> vector<8x512xf32>
    %cst = arith.constant 0.000000e+00 : f32
    %47 = vector.broadcast %cst : f32 to vector<8x512xf32>
    %48 = arith.select %43, %46, %47 : vector<8x512xi1>, vector<8x512xf32>
    %c1_i32_15 = arith.constant 1 : i32
    %49 = tpu.dynamic_rotate %48 by %c1_i32_15 dim 1 : vector<8x512xf32>, i32 -> vector<8x512xf32>
    %cst_16 = arith.constant 0.000000e+00 : f32
    %50 = vector.broadcast %cst_16 : f32 to vector<8x512xf32>
    %51 = arith.select %39, %49, %50 : vector<8x512xi1>, vector<8x512xf32>
    %c511_i32 = arith.constant 511 : i32
    %52 = tpu.dynamic_rotate %48 by %c511_i32 dim 1 : vector<8x512xf32>, i32 -> vector<8x512xf32>
    %cst_17 = arith.constant 0.000000e+00 : f32
    %53 = vector.broadcast %cst_17 : f32 to vector<8x512xf32>
    %54 = arith.select %41, %52, %53 : vector<8x512xi1>, vector<8x512xf32>
    %55 = tpu.concatenate %51, %48, %54 in 0 : vector<8x512xf32>, vector<8x512xf32>, vector<8x512xf32> -> vector<24x512xf32>
    %c0_18 = arith.constant 0 : index
    %c0_19 = arith.constant 0 : index
    %c0_20 = arith.constant 0 : index
    %56 = vector.load %arg2[%c0_18, %c0_19, %c0_20] : memref<3x8x24xf32, #tpu.memory_space<vmem>>, vector<1x8x24xf32>
    %57 = vector.shape_cast %56 : vector<1x8x24xf32> to vector<8x24xf32>
    %cst_21 = arith.constant dense<0.000000e+00> : vector<8x512xf32>
    %58 = tpu.matmul %57, %55, %cst_21 {dimension_numbers = #tpu.dot_dimension_numbers<[1], [0], [0], [1], [0, 0, 1, 1], [], []>} : vector<8x24xf32>, vector<24x512xf32>, vector<8x512xf32> -> vector<8x512xf32>
    %c1_i32_22 = arith.constant 1 : i32
    %59 = tpu.dynamic_rotate %4 by %c1_i32_22 dim 1 : vector<8x512xf32>, i32 -> vector<8x512xf32>
    %cst_23 = arith.constant 0.000000e+00 : f32
    %60 = vector.broadcast %cst_23 : f32 to vector<8x512xf32>
    %61 = arith.select %39, %59, %60 : vector<8x512xi1>, vector<8x512xf32>
    %c511_i32_24 = arith.constant 511 : i32
    %62 = tpu.dynamic_rotate %4 by %c511_i32_24 dim 1 : vector<8x512xf32>, i32 -> vector<8x512xf32>
    %cst_25 = arith.constant 0.000000e+00 : f32
    %63 = vector.broadcast %cst_25 : f32 to vector<8x512xf32>
    %64 = arith.select %41, %62, %63 : vector<8x512xi1>, vector<8x512xf32>
    %65 = tpu.concatenate %61, %4, %64 in 0 : vector<8x512xf32>, vector<8x512xf32>, vector<8x512xf32> -> vector<24x512xf32>
    %c1_26 = arith.constant 1 : index
    %c0_27 = arith.constant 0 : index
    %c0_28 = arith.constant 0 : index
    %66 = vector.load %arg2[%c1_26, %c0_27, %c0_28] : memref<3x8x24xf32, #tpu.memory_space<vmem>>, vector<1x8x24xf32>
    %67 = vector.shape_cast %66 : vector<1x8x24xf32> to vector<8x24xf32>
    %cst_29 = arith.constant dense<0.000000e+00> : vector<8x512xf32>
    %68 = tpu.matmul %67, %65, %cst_29 {dimension_numbers = #tpu.dot_dimension_numbers<[1], [0], [0], [1], [0, 0, 1, 1], [], []>} : vector<8x24xf32>, vector<24x512xf32>, vector<8x512xf32> -> vector<8x512xf32>
    %69 = arith.addf %58, %68 : vector<8x512xf32>
    %c496_i32 = arith.constant 496 : i32
    %70 = tpu.dynamic_rotate %4 by %c496_i32 dim 1 : vector<8x512xf32>, i32 -> vector<8x512xf32>
    %cst_30 = arith.constant 0.000000e+00 : f32
    %71 = vector.broadcast %cst_30 : f32 to vector<8x512xf32>
    %72 = arith.select %45, %70, %71 : vector<8x512xi1>, vector<8x512xf32>
    %c1_i32_31 = arith.constant 1 : i32
    %73 = tpu.dynamic_rotate %72 by %c1_i32_31 dim 1 : vector<8x512xf32>, i32 -> vector<8x512xf32>
    %cst_32 = arith.constant 0.000000e+00 : f32
    %74 = vector.broadcast %cst_32 : f32 to vector<8x512xf32>
    %75 = arith.select %39, %73, %74 : vector<8x512xi1>, vector<8x512xf32>
    %c511_i32_33 = arith.constant 511 : i32
    %76 = tpu.dynamic_rotate %72 by %c511_i32_33 dim 1 : vector<8x512xf32>, i32 -> vector<8x512xf32>
    %cst_34 = arith.constant 0.000000e+00 : f32
    %77 = vector.broadcast %cst_34 : f32 to vector<8x512xf32>
    %78 = arith.select %41, %76, %77 : vector<8x512xi1>, vector<8x512xf32>
    %79 = tpu.concatenate %75, %72, %78 in 0 : vector<8x512xf32>, vector<8x512xf32>, vector<8x512xf32> -> vector<24x512xf32>
    %c2 = arith.constant 2 : index
    %c0_35 = arith.constant 0 : index
    %c0_36 = arith.constant 0 : index
    %80 = vector.load %arg2[%c2, %c0_35, %c0_36] : memref<3x8x24xf32, #tpu.memory_space<vmem>>, vector<1x8x24xf32>
    %81 = vector.shape_cast %80 : vector<1x8x24xf32> to vector<8x24xf32>
    %cst_37 = arith.constant dense<0.000000e+00> : vector<8x512xf32>
    %82 = tpu.matmul %81, %79, %cst_37 {dimension_numbers = #tpu.dot_dimension_numbers<[1], [0], [0], [1], [0, 0, 1, 1], [], []>} : vector<8x24xf32>, vector<24x512xf32>, vector<8x512xf32> -> vector<8x512xf32>
    %83 = arith.addf %69, %82 : vector<8x512xf32>
    %c0_38 = arith.constant 0 : index
    %c0_39 = arith.constant 0 : index
    %84 = vector.load %arg3[%c0_38, %c0_39] : memref<8x1xf32, #tpu.memory_space<vmem>>, vector<8x1xf32>
    %85 = vector.broadcast %84 : vector<8x1xf32> to vector<8x512xf32>
    %86 = arith.addf %83, %85 : vector<8x512xf32>
    %cst_40 = arith.constant 0.000000e+00 : f32
    %87 = vector.broadcast %cst_40 : f32 to vector<8x512xf32>
    %88 = arith.maximumf %86, %87 : vector<8x512xf32>
    %c16_i32_41 = arith.constant 16 : i32
    %89 = tpu.dynamic_rotate %88 by %c16_i32_41 dim 1 : vector<8x512xf32>, i32 -> vector<8x512xf32>
    %cst_42 = arith.constant 0.000000e+00 : f32
    %90 = vector.broadcast %cst_42 : f32 to vector<8x512xf32>
    %91 = arith.select %43, %89, %90 : vector<8x512xi1>, vector<8x512xf32>
    %c1_i32_43 = arith.constant 1 : i32
    %92 = tpu.dynamic_rotate %91 by %c1_i32_43 dim 1 : vector<8x512xf32>, i32 -> vector<8x512xf32>
    %cst_44 = arith.constant 0.000000e+00 : f32
    %93 = vector.broadcast %cst_44 : f32 to vector<8x512xf32>
    %94 = arith.select %39, %92, %93 : vector<8x512xi1>, vector<8x512xf32>
    %c511_i32_45 = arith.constant 511 : i32
    %95 = tpu.dynamic_rotate %91 by %c511_i32_45 dim 1 : vector<8x512xf32>, i32 -> vector<8x512xf32>
    %cst_46 = arith.constant 0.000000e+00 : f32
    %96 = vector.broadcast %cst_46 : f32 to vector<8x512xf32>
    %97 = arith.select %41, %95, %96 : vector<8x512xi1>, vector<8x512xf32>
    %98 = tpu.concatenate %94, %91, %97 in 0 : vector<8x512xf32>, vector<8x512xf32>, vector<8x512xf32> -> vector<24x512xf32>
    %c0_47 = arith.constant 0 : index
    %c0_48 = arith.constant 0 : index
    %c0_49 = arith.constant 0 : index
    %99 = vector.load %arg4[%c0_47, %c0_48, %c0_49] : memref<3x8x24xf32, #tpu.memory_space<vmem>>, vector<1x8x24xf32>
    %100 = vector.shape_cast %99 : vector<1x8x24xf32> to vector<8x24xf32>
    %cst_50 = arith.constant dense<0.000000e+00> : vector<8x512xf32>
    %101 = tpu.matmul %100, %98, %cst_50 {dimension_numbers = #tpu.dot_dimension_numbers<[1], [0], [0], [1], [0, 0, 1, 1], [], []>} : vector<8x24xf32>, vector<24x512xf32>, vector<8x512xf32> -> vector<8x512xf32>
    %c1_i32_51 = arith.constant 1 : i32
    %102 = tpu.dynamic_rotate %88 by %c1_i32_51 dim 1 : vector<8x512xf32>, i32 -> vector<8x512xf32>
    %cst_52 = arith.constant 0.000000e+00 : f32
    %103 = vector.broadcast %cst_52 : f32 to vector<8x512xf32>
    %104 = arith.select %39, %102, %103 : vector<8x512xi1>, vector<8x512xf32>
    %c511_i32_53 = arith.constant 511 : i32
    %105 = tpu.dynamic_rotate %88 by %c511_i32_53 dim 1 : vector<8x512xf32>, i32 -> vector<8x512xf32>
    %cst_54 = arith.constant 0.000000e+00 : f32
    %106 = vector.broadcast %cst_54 : f32 to vector<8x512xf32>
    %107 = arith.select %41, %105, %106 : vector<8x512xi1>, vector<8x512xf32>
    %108 = tpu.concatenate %104, %88, %107 in 0 : vector<8x512xf32>, vector<8x512xf32>, vector<8x512xf32> -> vector<24x512xf32>
    %c1_55 = arith.constant 1 : index
    %c0_56 = arith.constant 0 : index
    %c0_57 = arith.constant 0 : index
    %109 = vector.load %arg4[%c1_55, %c0_56, %c0_57] : memref<3x8x24xf32, #tpu.memory_space<vmem>>, vector<1x8x24xf32>
    %110 = vector.shape_cast %109 : vector<1x8x24xf32> to vector<8x24xf32>
    %cst_58 = arith.constant dense<0.000000e+00> : vector<8x512xf32>
    %111 = tpu.matmul %110, %108, %cst_58 {dimension_numbers = #tpu.dot_dimension_numbers<[1], [0], [0], [1], [0, 0, 1, 1], [], []>} : vector<8x24xf32>, vector<24x512xf32>, vector<8x512xf32> -> vector<8x512xf32>
    %112 = arith.addf %101, %111 : vector<8x512xf32>
    %c496_i32_59 = arith.constant 496 : i32
    %113 = tpu.dynamic_rotate %88 by %c496_i32_59 dim 1 : vector<8x512xf32>, i32 -> vector<8x512xf32>
    %cst_60 = arith.constant 0.000000e+00 : f32
    %114 = vector.broadcast %cst_60 : f32 to vector<8x512xf32>
    %115 = arith.select %45, %113, %114 : vector<8x512xi1>, vector<8x512xf32>
    %c1_i32_61 = arith.constant 1 : i32
    %116 = tpu.dynamic_rotate %115 by %c1_i32_61 dim 1 : vector<8x512xf32>, i32 -> vector<8x512xf32>
    %cst_62 = arith.constant 0.000000e+00 : f32
    %117 = vector.broadcast %cst_62 : f32 to vector<8x512xf32>
    %118 = arith.select %39, %116, %117 : vector<8x512xi1>, vector<8x512xf32>
    %c511_i32_63 = arith.constant 511 : i32
    %119 = tpu.dynamic_rotate %115 by %c511_i32_63 dim 1 : vector<8x512xf32>, i32 -> vector<8x512xf32>
    %cst_64 = arith.constant 0.000000e+00 : f32
    %120 = vector.broadcast %cst_64 : f32 to vector<8x512xf32>
    %121 = arith.select %41, %119, %120 : vector<8x512xi1>, vector<8x512xf32>
    %122 = tpu.concatenate %118, %115, %121 in 0 : vector<8x512xf32>, vector<8x512xf32>, vector<8x512xf32> -> vector<24x512xf32>
    %c2_65 = arith.constant 2 : index
    %c0_66 = arith.constant 0 : index
    %c0_67 = arith.constant 0 : index
    %123 = vector.load %arg4[%c2_65, %c0_66, %c0_67] : memref<3x8x24xf32, #tpu.memory_space<vmem>>, vector<1x8x24xf32>
    %124 = vector.shape_cast %123 : vector<1x8x24xf32> to vector<8x24xf32>
    %cst_68 = arith.constant dense<0.000000e+00> : vector<8x512xf32>
    %125 = tpu.matmul %124, %122, %cst_68 {dimension_numbers = #tpu.dot_dimension_numbers<[1], [0], [0], [1], [0, 0, 1, 1], [], []>} : vector<8x24xf32>, vector<24x512xf32>, vector<8x512xf32> -> vector<8x512xf32>
    %126 = arith.addf %112, %125 : vector<8x512xf32>
    %c0_69 = arith.constant 0 : index
    %c0_70 = arith.constant 0 : index
    %127 = vector.load %arg5[%c0_69, %c0_70] : memref<8x1xf32, #tpu.memory_space<vmem>>, vector<8x1xf32>
    %128 = vector.broadcast %127 : vector<8x1xf32> to vector<8x512xf32>
    %129 = arith.addf %126, %128 : vector<8x512xf32>
    %cst_71 = arith.constant 0.000000e+00 : f32
    %130 = vector.broadcast %cst_71 : f32 to vector<8x512xf32>
    %131 = arith.maximumf %129, %130 : vector<8x512xf32>
    %132 = arith.addf %131, %4 : vector<8x512xf32>
    %cst_72 = arith.constant 0.000000e+00 : f32
    %133 = vector.broadcast %cst_72 : f32 to vector<8x512xf32>
    %134 = arith.maximumf %132, %133 : vector<8x512xf32>
    %135 = vector.extract_strided_slice %134 {offsets = [0, 0], sizes = [8, 256], strides = [1, 1]} : vector<8x512xf32> to vector<8x256xf32>
    %c0_73 = arith.constant 0 : index
    %c0_74 = arith.constant 0 : index
    %c0_75 = arith.constant 0 : index
    %136 = vector.load %arg6[%c0_73, %c0_74, %c0_75] : memref<2x8x256xf32, #tpu.memory_space<vmem>>, vector<1x8x256xf32>
    %137 = vector.shape_cast %136 : vector<1x8x256xf32> to vector<8x256xf32>
    %138 = vector.shape_cast %135 : vector<8x256xf32> to vector<1x8x256xf32>
    tpu.vector_store %arg6[%c0_73, %c0_74, %c0_75], %138 {strides = array<i32>} : memref<2x8x256xf32, #tpu.memory_space<vmem>>, vector<1x8x256xf32>,
    %139 = vector.extract_strided_slice %134 {offsets = [0, 256], sizes = [8, 256], strides = [1, 1]} : vector<8x512xf32> to vector<8x256xf32>
    %c1_76 = arith.constant 1 : index
    %c0_77 = arith.constant 0 : index
    %c0_78 = arith.constant 0 : index
    %140 = vector.load %arg6[%c1_76, %c0_77, %c0_78] : memref<2x8x256xf32, #tpu.memory_space<vmem>>, vector<1x8x256xf32>
    %141 = vector.shape_cast %140 : vector<1x8x256xf32> to vector<8x256xf32>
    %142 = vector.shape_cast %139 : vector<8x256xf32> to vector<1x8x256xf32>
    tpu.vector_store %arg6[%c1_76, %c0_77, %c0_78], %142 {strides = array<i32>} : memref<2x8x256xf32, #tpu.memory_space<vmem>>, vector<1x8x256xf32>,
    return
  }
  func.func @transform_0(%arg0: i32) -> (i32, i32, i32) {
    %c0_i32 = arith.constant 0 : i32
    %c0_i32_0 = arith.constant 0 : i32
    %c0_i32_1 = arith.constant 0 : i32
    return %arg0, %c0_i32, %c0_i32_0 : i32, i32, i32
  }
  func.func @transform_1(%arg0: i32) -> (i32, i32, i32) {
    %c0_i32 = arith.constant 0 : i32
    %c0_i32_0 = arith.constant 0 : i32
    %c0_i32_1 = arith.constant 0 : i32
    %c0_i32_2 = arith.constant 0 : i32
    return %c0_i32, %c0_i32_0, %c0_i32_1 : i32, i32, i32
  }
  func.func @transform_2(%arg0: i32) -> (i32, i32) {
    %c0_i32 = arith.constant 0 : i32
    %c0_i32_0 = arith.constant 0 : i32
    %c0_i32_1 = arith.constant 0 : i32
    return %c0_i32, %c0_i32_0 : i32, i32
  }
  func.func @transform_3(%arg0: i32) -> (i32, i32, i32) {
    %c0_i32 = arith.constant 0 : i32
    %c0_i32_0 = arith.constant 0 : i32
    %c0_i32_1 = arith.constant 0 : i32
    %c0_i32_2 = arith.constant 0 : i32
    return %c0_i32, %c0_i32_0, %c0_i32_1 : i32, i32, i32
  }
  func.func @transform_4(%arg0: i32) -> (i32, i32) {
    %c0_i32 = arith.constant 0 : i32
    %c0_i32_0 = arith.constant 0 : i32
    %c0_i32_1 = arith.constant 0 : i32
    return %c0_i32, %c0_i32_0 : i32, i32
  }
  func.func @transform_5(%arg0: i32) -> (i32, i32, i32) {
    %c0_i32 = arith.constant 0 : i32
    %c0_i32_0 = arith.constant 0 : i32
    %c0_i32_1 = arith.constant 0 : i32
    return %arg0, %c0_i32, %c0_i32_0 : i32, i32, i32
  }
}

</mosaic_0001>

<bundles_post_ra>
// kernel: _basic_block_2_impl.1
= control target key start
LH: loop header
LB: loop body
LE: loop exit
PB: predicated region body
PF: predicated region fallthrough
CT: control target
= control target key end

     0   :  { %s1059_s22 = smov 16   ;;  %s1060_s23 = smov 112   ;;  %v25_v6 = vlaneseq  ;;  %v1683_v32 = vmov 0  ;;  %v1685_v34 = vmov 0  ;;  %s1667_s0 = inlined_call_operand.vmem [shape: f32[2,8,256], index: 0, kind: input, shape index: {}]   ;;  %s1668_s1 = inlined_call_operand.vmem [shape: f32[3,8,24], index: 1, kind: input, shape index: {}]   ;;  %s1669_s2 = inlined_call_operand.vmem [shape: f32[8,1], index: 2, kind: input, shape index: {}]   ;;  %s1670_s4 = inlined_call_operand.vmem [shape: f32[8,1], index: 4, kind: input, shape index: {}]   ;;  %s1671_s3 = inlined_call_operand.vmem [shape: f32[3,8,24], index: 3, kind: input, shape index: {}]   ;;  %s1672_s5 = inlined_call_operand.vmem [shape: f32[2,8,256], index: 5, kind: output, shape index: {}]  }
   0x1   :  { %v1097_v0 = vld [vmem:[%s1667_s0 + $0x10] sm:$0xff]  ;;  %v1102_v1 = vld [vmem:[%s1667_s0] sm:$0xff]  ;;  %v1113_v2 = vld [vmem:[%s1667_s0 + $0x18] sm:$0xff]  ;;  %s1061_s28 = smov 127  }
   0x2   :  { %146 = vrot.lane.b32.xlu1 %v1097_v0, %s1059_s22  ;;  %142 = vrot.lane.b32.xlu0 %v1102_v1, %s1059_s22  ;;  %v1118_v3 = vld [vmem:[%s1667_s0 + $0x8] sm:$0xff]  ;;  %s1062_s0 = smov 1   ;;  %v1146_v7 = vand.u32 127, %v25_v6 }
   0x3   :  { %395 = vrot.lane.b32.xlu2 %v1102_v1, %s1060_s23 }
   0x4   :  { %vm150_vm0 = vcmp.lt.s32.totalorder %v1146_v7, 16  ;;  %v1164_v13 = vadd.s32 256, %v1146_v7  ;;  %vm1673_vm1 = vcmp.lt.s32.totalorder %v1146_v7, 112  ;;  %v82_v19 = vand.u32 255, %v1146_v7 }
   0x5   :  { %v27_v25 = vadd.s32 128, %v1146_v7  ;;  %v29_v26 = vadd.s32 384, %v1146_v7  ;;  %vm1676_vm6 = vcmp.lt.s32.totalorder %v1146_v7, 127  ;;  %vm1675_vm9 = vcmp.lt.s32.totalorder %v1146_v7, 1 }
   0x6   :  { %v96_v20 = vand.u32 255, %v1164_v13  ;;  %vm1183_vm2 = vcmp.ge.s32.totalorder %v82_v19, 16  ;;  %v48_v39 = vand.u32 15, %v1164_v13  ;;  %v34_v50 = vand.u32 15, %v1146_v7 }
   0x7   :  { %v89_v29 = vand.u32 255, %v27_v25  ;;  %v103_v30 = vand.u32 255, %v29_v26  ;;  %v41_v40 = vand.u32 15, %v27_v25  ;;  %v55_v48 = vand.u32 15, %v29_v26 }
   0x8   :  { %vm1195_vm3 = vcmp.ge.s32.totalorder %v96_v20, 16  ;;  %vm1247_vm8 = vcmp.lt.s32.totalorder %v48_v39, 15  ;;  %vm1273_vm11 = vcmp.ge.s32.totalorder %v48_v39, 1  ;;  %vm1279_vm12 = vcmp.lt.s32.totalorder %v34_v50, 15 }
   0x9   :  { %vm1214_vm4 = vcmp.lt.s32.totalorder %v89_v29, 240  ;;  %vm1222_vm5 = vcmp.lt.s32.totalorder %v103_v30, 240  ;;  %vm1243_vm7 = vcmp.lt.s32.totalorder %v41_v40, 15  ;;  %vm1265_vm10 = vcmp.lt.s32.totalorder %v55_v48, 15 }
   0xa   :  { %148 = vrot.lane.b32.xlu1 %v1113_v2, %s1059_s22  ;;  %144 = vrot.lane.b32.xlu0 %v1118_v3, %s1059_s22  ;;  %v1684_v32 = vsel %vm1214_vm4, 4294967295, %v1683_v32  ;;  %v1686_v34 = vsel %vm1222_vm5, 4294967295, %v1685_v34  ;;  %vm1285_vm13 = vcmp.ge.s32.totalorder %v55_v48, 1  ;;  %vm1297_vm14 = vcmp.ge.s32.totalorder %v34_v50, 1 }
   0xb   :  { %401 = vrot.lane.b32.xlu2 %v1113_v2, %s1060_s23  ;;  %vm1301_vm15 = vcmp.ge.s32.totalorder %v41_v40, 1  ;;  %v1063_v19 = vmov 0  }
   0xc   :  { %1057 = vset.pattern.permute.xlu2 %v1063_v19  ;;  %1058 = vset.pattern.permute.xlu0 %v1063_v19 }
  0x12   :  { %399 = vrot.lane.b32.xlu1 %v1097_v0, %s1060_s23  ;;  %397 = vrot.lane.b32.xlu0 %v1118_v3, %s1060_s23 }
  0x13   :  { %210 = vrot.lane.b32.xlu2 %v1102_v1, %s1061_s28 }
  0x1a   :  { %214 = vrot.lane.b32.xlu0 %v1097_v0, %s1061_s28  ;;  %216 = vrot.lane.b32.xlu1 %v1113_v2, %s1061_s28 }
  0x1b   :  { %196 = vrot.lane.b32.xlu2 %v1118_v3, %s1062_s0 }
  0x22   :  { %198 = vrot.lane.b32.xlu0 %v1097_v0, %s1062_s0  ;;  %200 = vrot.lane.b32.xlu1 %v1113_v2, %s1062_s0 }
  0x23   :  { %212 = vrot.lane.b32.xlu2 %v1118_v3, %s1061_s28 }
  0x2a   :  { %194 = vrot.lane.b32.xlu0 %v1102_v1, %s1062_s0 }
  0x5d   :  { %v396_v8 = vpop.permute.xlu2 %395 }
  0x65   :  { %v402_v14 = vpop.permute.xlu2 %401 }
  0x66   :  { %v1220_v33 = vsel %vm1673_vm1, %v402_v14, %v396_v8 }
  0x67   :  { %v411_v36 = vsel %vm1222_vm5, %v1220_v33, 0.0 }
  0x6d   :  { %v211_v37 = vpop.permute.xlu2 %210 }
  0x74   :  { %v147_v4 = vpop.permute.xlu1 %146  ;;  %v143_v5 = vpop.permute.xlu0 %142 }
  0x75   :  { %v197_v38 = vpop.permute.xlu2 %196 }
  0x7c   :  { %v149_v9 = vpop.permute.xlu1 %148  ;;  %v145_v10 = vpop.permute.xlu0 %144 }
  0x7d   :  { %v1151_v11 = vsel %vm150_vm0, %v147_v4, %v149_v9  ;;  %v1155_v12 = vsel %vm150_vm0, %v143_v5, %v145_v10  ;;  %v1189_v22 = vsel %vm150_vm0, %v149_v9, %v143_v5  ;;  %v1193_v23 = vsel %vm150_vm0, %v145_v10, %v147_v4  ;;  %v213_v41 = vpop.permute.xlu2 %212  ;;  %v966_v5 = vld [vmem:[%s1668_s1 + $0x8] sm:$0xff] }
  0x7e   :  { %182 = vrot.lane.b32.xlu2 %v1151_v11, %s1061_s28  ;;  %165 = vrot.lane.b32.xlu0 %v1151_v11, %s1062_s0  ;;  %v155_v27 = vsel %vm1183_vm2, %v1189_v22, 0.0  ;;  %v157_v28 = vsel %vm1195_vm3, %v1193_v23, 0.0  ;;  %v220_v51 = vsel %vm1676_vm6, %v211_v37, %v213_v41 }
  0x7f   :  { %161 = vrot.lane.b32.xlu1 %v1155_v12, %s1062_s0  ;;  %967 = vmatpush.msk.msra.mxu0 %vm1279_vm12, %v220_v51 }
  0x81   :  { %246 = vmatpush.msra.mxu0 %v1102_v1 }
  0x84   :  { %v400_v15 = vpop.permute.xlu1 %399  ;;  %v398_v16 = vpop.permute.xlu0 %397 }
  0x85   :  { %v1169_v17 = vsel %vm1673_vm1, %v400_v15, %v402_v14  ;;  %v1173_v18 = vsel %vm1673_vm1, %v396_v8, %v398_v16  ;;  %v1212_v31 = vsel %vm1673_vm1, %v398_v16, %v400_v15  ;;  %vm1674_vm1 = vcmask 195584   ;;  %v533_v16 = vld [vmem:[%s1669_s2] sm:$0xff] }
  0x86   :  { %432 = vrot.lane.b32.xlu0 %v1169_v17, %s1061_s28  ;;  %428 = vrot.lane.b32.xlu2 %v1173_v18, %s1061_s28  ;;  %v409_v35 = vsel %vm1214_vm4, %v1212_v31, 0.0 }
  0x87   :  { %178 = vrot.lane.b32.xlu1 %v1155_v12, %s1061_s28 }
  0x8c   :  { %v215_v42 = vpop.permute.xlu0 %214  ;;  %v217_v43 = vpop.permute.xlu1 %216 }
  0x8d   :  { %v219_v46 = vsel %vm1676_vm6, %v213_v41, %v215_v42  ;;  %v218_v47 = vsel %vm1676_vm6, %v215_v42, %v217_v43  ;;  %v221_v53 = vsel %vm1676_vm6, %v217_v43, %v211_v37  ;;  %v193_v37 = vld [vmem:[%s1668_s1] sm:$0xff] }
  0x8e   :  { %176 = vrot.lane.b32.xlu0 %v155_v27, %s1061_s28  ;;  %163 = vrot.lane.b32.xlu2 %v157_v28, %s1062_s0 }
  0x8f   :  { %180 = vrot.lane.b32.xlu1 %v157_v28, %s1061_s28  ;;  %970 = vmatpush.msk.msra.mxu1 %vm1243_vm7, %v219_v46 }
  0x90   :  { %973 = vmatpush.msk.msra.mxu2 %vm1247_vm8, %v218_v47  ;;  %976 = vmatpush.msk.msra.mxu3 %vm1265_vm10, %v221_v53 }
  0x91   :  { %266 = vmatpush.msra.mxu1 %v1118_v3 }
  0x92   :  { %286 = vmatpush.msra.mxu2 %v1097_v0  ;;  %306 = vmatpush.msra.mxu3 %v1113_v2 }
  0x94   :  { %v199_v49 = vpop.permute.xlu0 %198  ;;  %v201_v54 = vpop.permute.xlu1 %200 }
  0x95   :  { %v203_v56 = vsel %vm1675_vm9, %v197_v38, %v199_v49  ;;  %v202_v59 = vsel %vm1675_vm9, %v199_v49, %v201_v54 }
  0x96   :  { %159 = vrot.lane.b32.xlu2 %v155_v27, %s1062_s0  ;;  %414 = vrot.lane.b32.xlu0 %v409_v35, %s1062_s0 }
  0x97   :  { %434 = vrot.lane.b32.xlu1 %v411_v36, %s1061_s28  ;;  %974 = vmatpush.msk.msra.mxu2 %vm1273_vm11, %v203_v56 }
  0x98   :  { %977 = vmatpush.msk.msra.mxu3 %vm1285_vm13, %v202_v59  ;;  %975 = vmatmul.msk.f32.vlgmr.msra.gmra.mxu2 %vm1674_vm1, %v966_v5 }
  0x99   :  { %978 = vmatmul.msk.f32.vlgmr.msra.gmra.mxu3 %vm1674_vm1, %v966_v5 }
  0x9c   :  { %v195_v60 = vpop.permute.xlu0 %194 }
  0x9d   :  { %v205_v63 = vsel %vm1675_vm9, %v201_v54, %v195_v60  ;;  %v204_v4 = vsel %vm1675_vm9, %v195_v60, %v197_v38 }
  0x9e   :  { %418 = vrot.lane.b32.xlu2 %v411_v36, %s1062_s0  ;;  %430 = vrot.lane.b32.xlu0 %v409_v35, %s1061_s28 }
  0x9f   :  { %416 = vrot.lane.b32.xlu1 %v1169_v17, %s1062_s0  ;;  %968 = vmatpush.msk.msra.mxu0 %vm1297_vm14, %v205_v63 }
  0xa0   :  { %971 = vmatpush.msk.msra.mxu1 %vm1301_vm15, %v204_v4  ;;  %969 = vmatmul.msk.f32.vlgmr.msra.gmra.mxu0 %vm1674_vm1, %v966_v5 }
  0xa1   :  { %972 = vmatmul.msk.f32.vlgmr.msra.gmra.mxu1 %vm1674_vm1, %v966_v5 }
  0xa6   :  { %536 = vperm.xlu2 %1057, %v533_v16  }
  0xa7   :  { %412 = vrot.lane.b32.xlu1 %v1173_v18, %s1062_s0 }
  0xd8   :  { %v183_v6 = vpop.permute.xlu2 %182 }
  0xe0   :  { %v429_v8 = vpop.permute.xlu2 %428 }
  0xe8   :  { %v164_v13 = vpop.permute.xlu2 %163 }
  0xf0   :  { %v166_v9 = vpop.permute.xlu0 %165  ;;  %v160_v28 = vpop.permute.xlu2 %159 }
  0xf1   :  { %v162_v10 = vpop.permute.xlu1 %161  ;;  %v171_v35 = vsel %vm1675_vm9, %v166_v9, %v160_v28  ;;  %v168_v36 = vsel %vm1675_vm9, %v164_v13, %v166_v9 }
  0xf8   :  { %v433_v14 = vpop.permute.xlu0 %432  ;;  %v419_v41 = vpop.permute.xlu2 %418 }
  0xf9   :  { %v179_v15 = vpop.permute.xlu1 %178 }
 0x100   :  { %v177_v20 = vpop.permute.xlu0 %176  ;;  %v537_v59 = vpop.permute.xlu2 %536 }
 0x101   :  { %v181_v25 = vpop.permute.xlu1 %180  ;;  %v187_v26 = vsel %vm1676_vm6, %v177_v20, %v179_v15  ;;  %v188_v27 = vsel %vm1676_vm6, %v183_v6, %v177_v20 }
 0x102   :  { %979 = vmatpush.msk.msrb.mxu0 %vm1279_vm12, %v187_v26  ;;  %v186_v29 = vsel %vm1676_vm6, %v179_v15, %v181_v25  ;;  %v185_v30 = vsel %vm1676_vm6, %v181_v25, %v183_v6  ;;  %990 = vmatpush.msk.msrb.mxu3 %vm1265_vm10, %v188_v27 }
 0x103   :  { %983 = vmatpush.msk.msrb.mxu1 %vm1243_vm7, %v186_v29  ;;  %986 = vmatpush.msk.msrb.mxu2 %vm1247_vm8, %v185_v30 }
 0x104   :  { %980 = vmatpush.msk.msrb.mxu0 %vm1183_vm2, %v1189_v22  ;;  %389 = vmatpush.msrb.mxu3 %v1151_v11  ;;  %v170_v11 = vsel %vm1675_vm9, %v160_v28, %v162_v10 }
 0x105   :  { %349 = vmatpush.msrb.mxu1 %v1155_v12  ;;  %987 = vmatpush.msk.msrb.mxu2 %vm1195_vm3, %v1193_v23  ;;  %v169_v12 = vsel %vm1675_vm9, %v162_v10, %v164_v13 }
 0x106   :  { %981 = vmatpush.msk.msrb.mxu0 %vm1297_vm14, %v171_v35  ;;  %991 = vmatpush.msk.msrb.mxu3 %vm1285_vm13, %v168_v36 }
 0x107   :  { %984 = vmatpush.msk.msrb.mxu1 %vm1301_vm15, %v170_v11  ;;  %988 = vmatpush.msk.msrb.mxu2 %vm1273_vm11, %v169_v12 }
 0x108   :  { %v415_v22 = vpop.permute.xlu0 %414  ;;  %982 = vmatmul.msk.f32.vlgmr.msrb.gmra.mxu0 %vm1674_vm1, %v193_v37  ;;  %989 = vmatmul.msk.f32.vlgmr.msrb.gmra.mxu2 %vm1674_vm1, %v193_v37 }
 0x109   :  { %v435_v23 = vpop.permute.xlu1 %434  ;;  %992 = vmatmul.msk.f32.vlgmr.msrb.gmra.mxu3 %vm1674_vm1, %v193_v37  ;;  %985 = vmatmul.msk.f32.vlgmr.msrb.gmra.mxu1 %vm1674_vm1, %v193_v37 }
 0x10a   :  { %v436_v38 = vsel %vm1676_vm6, %v433_v14, %v435_v23  ;;  %v439_v39 = vsel %vm1676_vm6, %v435_v23, %v429_v8 }
 0x10b   :  { %1001 = vmatpush.msk.msra.mxu2 %vm1247_vm8, %v436_v38  ;;  %1004 = vmatpush.msk.msra.mxu3 %vm1265_vm10, %v439_v39 }
 0x10d   :  { %503 = vmatpush.msra.mxu2 %v1169_v17  ;;  %1005 = vmatpush.msk.msra.mxu3 %vm1222_vm5, %v1220_v33  ;;  %v993_v17 = vld [vmem:[%s1668_s1 + $0x10] sm:$0xff] }
 0x110   :  { %v431_v40 = vpop.permute.xlu0 %430 }
 0x111   :  { %v417_v42 = vpop.permute.xlu1 %416  ;;  %v437_v43 = vsel %vm1676_vm6, %v431_v40, %v433_v14  ;;  %v438_v46 = vsel %vm1676_vm6, %v429_v8, %v431_v40 }
 0x112   :  { %v420_v47 = vsel %vm1675_vm9, %v417_v42, %v419_v41  ;;  %v421_v48 = vsel %vm1675_vm9, %v415_v22, %v417_v42  ;;  %994 = vmatpush.msk.msra.mxu0 %vm1279_vm12, %v438_v46  ;;  %997 = vmatpush.msk.msra.mxu1 %vm1243_vm7, %v437_v43 }
 0x113   :  { %1002 = vmatpush.msk.msra.mxu2 %vm1273_vm11, %v421_v48  ;;  %1006 = vmatpush.msk.msra.mxu3 %vm1285_vm13, %v420_v47 }
 0x114   :  { %463 = vmatpush.msra.mxu0 %v1173_v18  ;;  %998 = vmatpush.msk.msra.mxu1 %vm1214_vm4, %v1212_v31 }
 0x115   :  { %1003 = vmatmul.msk.f32.vlgmr.msra.gmra.mxu2 %vm1674_vm1, %v993_v17  ;;  %1007 = vmatmul.msk.f32.vlgmr.msra.gmra.mxu3 %vm1674_vm1, %v993_v17 }
 0x119   :  { %v413_v33 = vpop.permute.xlu1 %412 }
 0x11a   :  { %v422_v49 = vsel %vm1675_vm9, %v413_v33, %v415_v22  ;;  %v423_v50 = vsel %vm1675_vm9, %v419_v41, %v413_v33 }
 0x11b   :  { %995 = vmatpush.msk.msra.mxu0 %vm1297_vm14, %v423_v50  ;;  %999 = vmatpush.msk.msra.mxu1 %vm1301_vm15, %v422_v49  ;;  %v289_v51 = vpop.f32.mrf.mxu2 }
 0x11c   :  { %996 = vmatmul.msk.f32.vlgmr.msra.gmra.mxu0 %vm1674_vm1, %v993_v17  ;;  %1000 = vmatmul.msk.f32.vlgmr.msra.gmra.mxu1 %vm1674_vm1, %v993_v17  ;;  %v309_v53 = vpop.f32.mrf.mxu3  ;;  %vm1703_vm1 = vcmp.lt.s32.totalorder %v1146_v7, 112 }
 0x11d   :  { %v249_v31 = vpop.f32.mrf.mxu0  ;;  %vm1704_vm9 = vmmov %vm1703_vm1 }
 0x11e   :  { %v269_v18 = vpop.f32.mrf.mxu1 }
 0x185   :  { %v332_v56 = vpop.f32.mrf.mxu0 }
 0x186   :  { %v352_v54 = vpop.f32.mrf.mxu1  ;;  %v333_v60 = vadd.f32 %v332_v56, %v249_v31 }
 0x187   :  { %v353_v63 = vadd.f32 %v352_v54, %v269_v18 }
 0x18b   :  { %v372_v4 = vpop.f32.mrf.mxu2 }
 0x18c   :  { %v392_v5 = vpop.f32.mrf.mxu3  ;;  %v373_v19 = vadd.f32 %v372_v4, %v289_v51 }
 0x18d   :  { %v393_v20 = vadd.f32 %v392_v5, %v309_v53 }
 0x198   :  { %v506_v25 = vpop.f32.mrf.mxu2  ;;  %v526_v26 = vpop.f32.mrf.mxu3 }
 0x199   :  { %v466_v6 = vpop.f32.mrf.mxu0  ;;  %v486_v8 = vpop.f32.mrf.mxu1  ;;  %v531_v27 = vadd.f32 %v506_v25, %v373_v19  ;;  %v532_v28 = vadd.f32 %v526_v26, %v393_v20  ;;  %v1008_v20 = vld [vmem:[%s1671_s3 + $0x8] sm:$0xff] }
 0x19a   :  { %v529_v9 = vadd.f32 %v466_v6, %v333_v60  ;;  %v530_v10 = vadd.f32 %v486_v8, %v353_v63 }
 0x19b   :  { %v541_v29 = vadd.f32 %v537_v59, %v531_v27  ;;  %v542_v30 = vadd.f32 %v537_v59, %v532_v28 }
 0x19c   :  { %v539_v13 = vadd.f32 %v537_v59, %v529_v9  ;;  %v540_v14 = vadd.f32 %v537_v59, %v530_v10 }
 0x19d   :  { %v1428_v35 = vmax.f32 %v541_v29, 0.0  ;;  %v546_v36 = vmax.f32 %v542_v30, 0.0 }
 0x19e   :  { %v543_v15 = vmax.f32 %v539_v13, 0.0  ;;  %v1417_v16 = vmax.f32 %v540_v14, 0.0 }
 0x1a0   :  { %612 = vrot.lane.b32.xlu2 %v543_v15, %s1061_s28  ;;  %547 = vrot.lane.b32.xlu0 %v543_v15, %s1059_s22 }
 0x1a1   :  { %549 = vrot.lane.b32.xlu1 %v1417_v16, %s1059_s22 }
 0x1a8   :  { %598 = vrot.lane.b32.xlu2 %v1417_v16, %s1062_s0  ;;  %798 = vrot.lane.b32.xlu0 %v1417_v16, %s1060_s23 }
 0x1a9   :  { %796 = vrot.lane.b32.xlu1 %v543_v15, %s1060_s23 }
 0x1b0   :  { %551 = vrot.lane.b32.xlu2 %v1428_v35, %s1059_s22  ;;  %553 = vrot.lane.b32.xlu0 %v546_v36, %s1059_s22 }
 0x1b1   :  { %800 = vrot.lane.b32.xlu1 %v1428_v35, %s1060_s23 }
 0x1b8   :  { %802 = vrot.lane.b32.xlu2 %v546_v36, %s1060_s23  ;;  %596 = vrot.lane.b32.xlu0 %v543_v15, %s1062_s0 }
 0x1b9   :  { %618 = vrot.lane.b32.xlu1 %v546_v36, %s1061_s28 }
 0x1c0   :  { %614 = vrot.lane.b32.xlu2 %v1417_v16, %s1061_s28  ;;  %616 = vrot.lane.b32.xlu0 %v1428_v35, %s1061_s28 }
 0x1c1   :  { %602 = vrot.lane.b32.xlu1 %v546_v36, %s1062_s0 }
 0x1c8   :  { %600 = vrot.lane.b32.xlu0 %v1428_v35, %s1062_s0 }
 0x1fa   :  { %v613_v37 = vpop.permute.xlu2 %612 }
 0x202   :  { %v599_v11 = vpop.permute.xlu2 %598 }
 0x20a   :  { %v552_v12 = vpop.permute.xlu2 %551 }
 0x212   :  { %v548_v22 = vpop.permute.xlu0 %547  ;;  %v803_v23 = vpop.permute.xlu2 %802 }
 0x213   :  { %v550_v38 = vpop.permute.xlu1 %549 }
 0x214   :  { %v1447_v39 = vsel %vm150_vm0, %v548_v22, %v550_v38  ;;  %v1465_v47 = vsel %vm150_vm0, %v550_v38, %v552_v12 }
 0x215   :  { %565 = vrot.lane.b32.xlu1 %v1447_v39, %s1062_s0  ;;  %v561_v49 = vsel %vm1195_vm3, %v1465_v47, 0.0 }
 0x21a   :  { %v615_v40 = vpop.permute.xlu2 %614  ;;  %v799_v41 = vpop.permute.xlu0 %798 }
 0x21b   :  { %v622_v42 = vsel %vm1676_vm6, %v613_v37, %v615_v40  ;;  %v797_v43 = vpop.permute.xlu1 %796 }
 0x21c   :  { %1009 = vmatpush.msk.msrb.mxu0 %vm1279_vm12, %v622_v42  ;;  %v1457_v46 = vsel %vm1703_vm1, %v797_v43, %v799_v41  ;;  %v1481_v50 = vsel %vm1703_vm1, %v803_v23, %v797_v43 }
 0x21d   :  { %581 = vrot.lane.b32.xlu1 %v1447_v39, %s1061_s28  ;;  %828 = vrot.lane.b32.xlu2 %v1457_v46, %s1061_s28  ;;  %v811_v54 = vsel %vm1222_vm5, %v1481_v50, 0.0 }
 0x21e   :  { %647 = vmatpush.msrb.mxu0 %v543_v15 }
 0x222   :  { %v554_v48 = vpop.permute.xlu0 %553 }
 0x223   :  { %v801_v17 = vpop.permute.xlu1 %800  ;;  %v1469_v33 = vsel %vm150_vm0, %v552_v12, %v554_v48  ;;  %v1500_v56 = vsel %vm150_vm0, %v554_v48, %v548_v22  ;;  %vm1706_vm0 = vmmov %vm1703_vm1  ;;  %v1035_v48 = vld [vmem:[%s1671_s3 + $0x10] sm:$0xff] }
 0x224   :  { %569 = vrot.lane.b32.xlu0 %v1469_v33, %s1062_s0  ;;  %v1485_v51 = vsel %vm1704_vm9, %v801_v17, %v803_v23  ;;  %v559_v5 = vsel %vm1183_vm2, %v1500_v56, 0.0  ;;  %vm1705_vm9 = vcmp.lt.s32.totalorder %v1146_v7, 1  ;;  %v1524_v8 = vsel %vm1706_vm0, %v799_v41, %v801_v17 }
 0x225   :  { %583 = vrot.lane.b32.xlu1 %v561_v49, %s1061_s28  ;;  %585 = vrot.lane.b32.xlu2 %v1469_v33, %s1061_s28  ;;  %vm1707_vm1 = vmmov %vm1705_vm9  ;;  %v809_v15 = vsel %vm1214_vm4, %v1524_v8, 0.0  ;;  %vm1714_vm4 = vcmp.lt.s32.totalorder %v1146_v7, 127 }
 0x226   :  { %vm1715_vm5 = vmmov %vm1714_vm4 }
 0x22a   :  { %v597_v18 = vpop.permute.xlu0 %596 }
 0x22b   :  { %v619_v31 = vpop.permute.xlu1 %618  ;;  %v606_v9 = vsel %vm1707_vm1, %v597_v18, %v599_v11 }
 0x22c   :  { %v623_v53 = vsel %vm1676_vm6, %v619_v31, %v613_v37  ;;  %832 = vrot.lane.b32.xlu0 %v1485_v51, %s1061_s28 }
 0x22d   :  { %834 = vrot.lane.b32.xlu1 %v811_v54, %s1061_s28  ;;  %567 = vrot.lane.b32.xlu2 %v561_v49, %s1062_s0 }
 0x22e   :  { %1018 = vmatpush.msk.msrb.mxu3 %vm1265_vm10, %v623_v53 }
 0x230   :  { %707 = vmatpush.msrb.mxu3 %v546_v36 }
 0x232   :  { %v617_v59 = vpop.permute.xlu0 %616 }
 0x233   :  { %v620_v60 = vsel %vm1676_vm6, %v617_v59, %v619_v31  ;;  %v621_v63 = vsel %vm1676_vm6, %v615_v40, %v617_v59  ;;  %v603_v4 = vpop.permute.xlu1 %602  ;;  %vm1709_vm6 = vmmov %vm1707_vm1 }
 0x234   :  { %v607_v6 = vsel %vm1705_vm9, %v603_v4, %v597_v18  ;;  %1012 = vmatpush.msk.msrb.mxu1 %vm1243_vm7, %v621_v63  ;;  %579 = vrot.lane.b32.xlu0 %v559_v5, %s1061_s28  ;;  %vm1708_vm9 = vmmov %vm1707_vm1 }
 0x235   :  { %563 = vrot.lane.b32.xlu2 %v559_v5, %s1062_s0  ;;  %816 = vrot.lane.b32.xlu1 %v1485_v51, %s1062_s0 }
 0x236   :  { %1010 = vmatpush.msk.msrb.mxu0 %vm1297_vm14, %v607_v6  ;;  %1015 = vmatpush.msk.msrb.mxu2 %vm1247_vm8, %v620_v60 }
 0x237   :  { %667 = vmatpush.msrb.mxu1 %v1417_v16  ;;  %v933_v16 = vld [vmem:[%s1670_s4] sm:$0xff] }
 0x238   :  { %687 = vmatpush.msrb.mxu2 %v1428_v35 }
 0x239   :  { %1013 = vmatpush.msk.msrb.mxu1 %vm1301_vm15, %v606_v9 }
 0x23a   :  { %v601_v10 = vpop.permute.xlu0 %600 }
 0x23b   :  { %v604_v13 = vsel %vm1708_vm9, %v601_v10, %v603_v4  ;;  %v605_v14 = vsel %vm1709_vm6, %v599_v11, %v601_v10  ;;  %vm1710_vm6 = vcmask 195584   ;;  %v595_v11 = vld [vmem:[%s1671_s3] sm:$0xff] }
 0x23c   :  { %814 = vrot.lane.b32.xlu0 %v809_v15, %s1062_s0  ;;  %1016 = vmatpush.msk.msrb.mxu2 %vm1273_vm11, %v605_v14  ;;  %vm1711_vm0 = vmmov %vm1710_vm6 }
 0x23d   :  { %818 = vrot.lane.b32.xlu2 %v811_v54, %s1062_s0  ;;  %812 = vrot.lane.b32.xlu1 %v1457_v46, %s1062_s0  ;;  %vm1712_vm1 = vmmov %vm1711_vm0 }
 0x23e   :  { %1019 = vmatpush.msk.msrb.mxu3 %vm1285_vm13, %v604_v13  ;;  %1017 = vmatmul.msk.f32.vlgmr.msrb.gmra.mxu2 %vm1710_vm6, %v1008_v20  ;;  %vm1713_vm9 = vmmov %vm1711_vm0 }
 0x23f   :  { %1020 = vmatmul.msk.f32.vlgmr.msrb.gmra.mxu3 %vm1711_vm0, %v1008_v20  ;;  %1011 = vmatmul.msk.f32.vlgmr.msrb.gmra.mxu0 %vm1712_vm1, %v1008_v20  ;;  %vm1718_vm6 = vmmov %vm1711_vm0 }
 0x240   :  { %1014 = vmatmul.msk.f32.vlgmr.msrb.gmra.mxu1 %vm1713_vm9, %v1008_v20 }
 0x244   :  { %830 = vrot.lane.b32.xlu0 %v809_v15, %s1061_s28 }
 0x245   :  { %936 = vperm.xlu2 %1057, %v933_v16  }
 0x277   :  { %v829_v19 = vpop.permute.xlu2 %828 }
 0x27f   :  { %v586_v25 = vpop.permute.xlu2 %585 }
 0x287   :  { %v566_v26 = vpop.permute.xlu1 %565  ;;  %v568_v27 = vpop.permute.xlu2 %567 }
 0x28f   :  { %v582_v28 = vpop.permute.xlu1 %581  ;;  %v564_v37 = vpop.permute.xlu2 %563 }
 0x296   :  { %v570_v29 = vpop.permute.xlu0 %569 }
 0x297   :  { %v584_v30 = vpop.permute.xlu1 %583 }
 0x298   :  { %v587_v35 = vsel %vm1714_vm4, %v584_v30, %v586_v25  ;;  %v588_v36 = vsel %vm1715_vm5, %v582_v28, %v584_v30  ;;  %vm1716_vm4 = vcmp.lt.s32.totalorder %v1146_v7, 1 }
 0x299   :  { %1025 = vmatpush.msk.msra.mxu1 %vm1243_vm7, %v588_v36  ;;  %1028 = vmatpush.msk.msra.mxu2 %vm1247_vm8, %v587_v35  ;;  %v572_v12 = vsel %vm1716_vm4, %v566_v26, %v568_v27  ;;  %vm1717_vm5 = vmmov %vm1716_vm4  ;;  %v574_v42 = vsel %vm1716_vm4, %v570_v29, %v564_v37 }
 0x29a   :  { %v573_v22 = vsel %vm1717_vm5, %v564_v37, %v566_v26 }
 0x29b   :  { %750 = vmatpush.msra.mxu1 %v1447_v39  ;;  %1029 = vmatpush.msk.msra.mxu2 %vm1195_vm3, %v1465_v47  ;;  %vm1719_vm3 = vmmov %vm1711_vm0  ;;  %vm1720_vm0 = vcmp.lt.s32.totalorder %v1146_v7, 127 }
 0x29c   :  { %vm1721_vm1 = vmmov %vm1720_vm0 }
 0x29d   :  { %1026 = vmatpush.msk.msra.mxu1 %vm1301_vm15, %v573_v22  ;;  %1030 = vmatpush.msk.msra.mxu2 %vm1273_vm11, %v572_v12  ;;  %vm1722_vm9 = vmmov %vm1720_vm0 }
 0x29e   :  { %v833_v23 = vpop.permute.xlu0 %832  ;;  %1031 = vmatmul.msk.f32.vlgmr.msra.gmra.mxu2 %vm1718_vm6, %v595_v11  ;;  %1027 = vmatmul.msk.f32.vlgmr.msra.gmra.mxu1 %vm1719_vm3, %v595_v11  ;;  %vm1724_vm5 = vmmov %vm1720_vm0 }
 0x29f   :  { %v835_v24 = vpop.permute.xlu1 %834  ;;  %vm1725_vm6 = vmmov %vm1719_vm3 }
 0x2a0   :  { %v836_v38 = vsel %vm1720_vm0, %v833_v23, %v835_v24  ;;  %v839_v43 = vsel %vm1724_vm5, %v835_v24, %v829_v19  ;;  %vm1728_vm0 = vnez %v1686_v34 }
 0x2a1   :  { %1043 = vmatpush.msk.msrb.mxu2 %vm1247_vm8, %v836_v38  ;;  %vm1723_vm8 = vmmov %vm1716_vm4 }
 0x2a2   :  { %v571_v45 = vsel %vm1723_vm8, %v568_v27, %v570_v29  ;;  %vm1732_vm8 = vmmov %vm1724_vm5 }
 0x2a3   :  { %903 = vmatpush.msrb.mxu2 %v1485_v51 }
 0x2a6   :  { %v580_v39 = vpop.permute.xlu0 %579 }
 0x2a7   :  { %v589_v40 = vsel %vm1721_vm1, %v580_v39, %v582_v28  ;;  %v590_v41 = vsel %vm1722_vm9, %v586_v25, %v580_v39  ;;  %v817_v21 = vpop.permute.xlu1 %816 }
 0x2a8   :  { %1021 = vmatpush.msk.msra.mxu0 %vm1279_vm12, %v589_v40  ;;  %1032 = vmatpush.msk.msra.mxu3 %vm1265_vm10, %v590_v41 }
 0x2aa   :  { %1022 = vmatpush.msk.msra.mxu0 %vm1183_vm2, %v1500_v56  ;;  %790 = vmatpush.msra.mxu3 %v1469_v33  ;;  %vm1726_vm2 = vmmov %vm1719_vm3  ;;  %v819_v33 = vpop.permute.xlu2 %818 }
 0x2ab   :  { %vm1727_vm3 = vmmov %vm1716_vm4 }
 0x2ac   :  { %1023 = vmatpush.msk.msra.mxu0 %vm1297_vm14, %v574_v42  ;;  %1033 = vmatpush.msk.msra.mxu3 %vm1285_vm13, %v571_v45  ;;  %vm1729_vm1 = vmmov %vm1727_vm3 }
 0x2ad   :  { %1034 = vmatmul.msk.f32.vlgmr.msra.gmra.mxu3 %vm1725_vm6, %v595_v11  ;;  %1024 = vmatmul.msk.f32.vlgmr.msra.gmra.mxu0 %vm1726_vm2, %v595_v11  ;;  %v820_v52 = vsel %vm1729_vm1, %v817_v21, %v819_v33  ;;  %vm1731_vm9 = vmmov %vm1726_vm2 }
 0x2ae   :  { %1046 = vmatpush.msk.msrb.mxu3 %vm1265_vm10, %v839_v43  ;;  %v815_v47 = vpop.permute.xlu0 %814  ;;  %vm1730_vm10 = vmmov %vm1726_vm2 }
 0x2af   :  { %v821_v17 = vsel %vm1727_vm3, %v815_v47, %v817_v21  ;;  %vm1733_vm4 = vmmov %vm1724_vm5 }
 0x2b0   :  { %1047 = vmatpush.msk.msrb.mxu3 %vm1728_vm0, %v1481_v50  ;;  %1044 = vmatpush.msk.msrb.mxu2 %vm1273_vm11, %v821_v17  ;;  %v813_v50 = vpop.permute.xlu1 %812  ;;  %vm1734_vm11 = vnez %v1684_v32  ;;  %vm1736_vm5 = vmmov %vm1729_vm1 }
 0x2b1   :  { %1045 = vmatmul.msk.f32.vlgmr.msrb.gmra.mxu2 %vm1730_vm10, %v1035_v48  ;;  %v823_v58 = vsel %vm1736_vm5, %v819_v33, %v813_v50 }
 0x2b2   :  { %1048 = vmatpush.msk.msrb.mxu3 %vm1285_vm13, %v820_v52  ;;  %vm1735_vm13 = vmmov %vm1729_vm1  ;;  %v937_v61 = vpop.permute.xlu2 %936 }
 0x2b3   :  { %v822_v55 = vsel %vm1735_vm13, %v813_v50, %v815_v47 }
 0x2b5   :  { %1049 = vmatmul.msk.f32.vlgmr.msrb.gmra.mxu3 %vm1731_vm9, %v1035_v48 }
 0x2b6   :  { %v831_v49 = vpop.permute.xlu0 %830 }
 0x2b7   :  { %v837_v18 = vsel %vm1732_vm8, %v831_v49, %v833_v23  ;;  %v838_v34 = vsel %vm1733_vm4, %v829_v19, %v831_v49 }
 0x2b8   :  { %1036 = vmatpush.msk.msrb.mxu0 %vm1279_vm12, %v838_v34  ;;  %1039 = vmatpush.msk.msrb.mxu1 %vm1243_vm7, %v837_v18  ;;  %vm1737_vm12 = vmmov %vm1726_vm2 }
 0x2b9   :  { %vm1738_vm7 = vmmov %vm1726_vm2 }
 0x2ba   :  { %863 = vmatpush.msrb.mxu0 %v1457_v46  ;;  %1040 = vmatpush.msk.msrb.mxu1 %vm1734_vm11, %v1524_v8 }
 0x2bc   :  { %1037 = vmatpush.msk.msrb.mxu0 %vm1297_vm14, %v823_v58  ;;  %1041 = vmatpush.msk.msrb.mxu1 %vm1301_vm15, %v822_v55  ;;  %v650_v32 = vpop.f32.mrf.mxu0 }
 0x2bd   :  { %1038 = vmatmul.msk.f32.vlgmr.msrb.gmra.mxu0 %vm1737_vm12, %v1035_v48  ;;  %1042 = vmatmul.msk.f32.vlgmr.msrb.gmra.mxu1 %vm1738_vm7, %v1035_v48  ;;  %v670_v46 = vpop.f32.mrf.mxu1 }
 0x2c1   :  { %v690_v44 = vpop.f32.mrf.mxu2 }
 0x2c2   :  { %v710_v57 = vpop.f32.mrf.mxu3 }
 0x31b   :  { %v753_v54 = vpop.f32.mrf.mxu1 }
 0x31c   :  { %v754_v5 = vadd.f32 %v753_v54, %v670_v46 }
 0x321   :  { %v773_v31 = vpop.f32.mrf.mxu2 }
 0x322   :  { %v774_v7 = vadd.f32 %v773_v31, %v690_v44 }
 0x32a   :  { %v733_v53 = vpop.f32.mrf.mxu0 }
 0x32b   :  { %v734_v4 = vadd.f32 %v733_v53, %v650_v32 }
 0x330   :  { %v793_v51 = vpop.f32.mrf.mxu3 }
 0x331   :  { %v794_v60 = vadd.f32 %v793_v51, %v710_v57 }
 0x334   :  { %v906_v56 = vpop.f32.mrf.mxu2 }
 0x335   :  { %v931_v59 = vadd.f32 %v906_v56, %v774_v7 }
 0x337   :  { %v941_v63 = vadd.f32 %v937_v61, %v931_v59 }
 0x338   :  { %v926_v62 = vpop.f32.mrf.mxu3 }
 0x339   :  { %v945_v6 = vmax.f32 %v941_v63, 0.0  ;;  %v932_v8 = vadd.f32 %v926_v62, %v794_v60 }
 0x33a   :  { %v866_v9 = vpop.f32.mrf.mxu0  ;;  %v886_v10 = vpop.f32.mrf.mxu1 }
 0x33b   :  { %v949_v13 = vadd.f32 %v1097_v0, %v945_v6  ;;  %v942_v14 = vadd.f32 %v937_v61, %v932_v8  ;;  %v929_v15 = vadd.f32 %v866_v9, %v734_v4  ;;  %v930_v16 = vadd.f32 %v886_v10, %v754_v5 }
 0x33d   :  { %v953_v19 = vmax.f32 %v949_v13, 0.0  ;;  %v946_v20 = vmax.f32 %v942_v14, 0.0  ;;  %v939_v25 = vadd.f32 %v937_v61, %v929_v15  ;;  %v940_v26 = vadd.f32 %v937_v61, %v930_v16 }
 0x33f   :  { %1050 = vst [vmem:[%s1672_s5 + $0x10] sm:$0xff] %v953_v19  ;;  %v950_v27 = vadd.f32 %v1113_v2, %v946_v20  ;;  %v943_v28 = vmax.f32 %v939_v25, 0.0  ;;  %v944_v29 = vmax.f32 %v940_v26, 0.0 }
 0x341   :  { %v954_v30 = vmax.f32 %v950_v27, 0.0  ;;  %v947_v35 = vadd.f32 %v943_v28, %v1102_v1  ;;  %v948_v0 = vadd.f32 %v944_v29, %v1118_v3 }
 0x343   :  { %1051 = vst [vmem:[%s1672_s5 + $0x18] sm:$0xff] %v954_v30  ;;  %v951_v36 = vmax.f32 %v947_v35, 0.0  ;;  %v952_v37 = vmax.f32 %v948_v0, 0.0 }
 0x345   :  { %955 = vst [vmem:[%s1672_s5] sm:$0xff] %v951_v36 }
 0x346   :  { %956 = vst [vmem:[%s1672_s5 + $0x8] sm:$0xff] %v952_v37 }

</bundles_post_ra>
